<compile_context>
chip_gen: v7x
topology: tpu7x:2x2x1
jax: 0.10.0
libtpu: 0.0.40
codegen_flags: <defaults>
</compile_context>

<pallas_src>
import jax
import jax.numpy as jnp
from jax.experimental import pallas as pl
from jax.experimental.pallas import tpu as pltpu

HIDDEN_SIZE = 32
BATCH = 2
SEQ = 8


def bahdanau_kernel(x_ref, w_ref, p_ref, ctx_ref, att_ref):
    """Inputs (all VMEM, packed host-side):
         x_ref : (B*S + B, H)  rows = [lstm rows ; final_hidden rows]
         w_ref : (H, 2H)       cols = [W_k^T | W_q^T]
         p_ref : (2, 2H)       row0 = [b_k | b_q], row1 = [w_v row | b_v, 0..]
       Outputs:
         ctx_ref: (B, H)   att_ref: (B, S, 1)
    """
    B, H = ctx_ref.shape
    S = att_ref.shape[1]
    BS = B * S

    x = x_ref[...]
    w = w_ref[...]
    p = p_ref[...]

    # Fused key + query projection: one MXU push, one bias add for both halves.
    proj = jnp.dot(x, w, preferred_element_type=jnp.float32) + p[0:1, :]
    keys = proj[:BS, :H].reshape(B, S, H)        # lstm rows, W_k columns
    query = proj[BS:, H:]                        # final_hidden rows, W_q columns

    tanhed = jnp.tanh(query[:, None, :] + keys)                      # (B, S, H)

    # W_v projection (out width 1): VPU mul + lane reduce, no wasted MXU pass.
    wv_row = p[1:2, :H]                                              # (1, H)
    bv = p[1:2, H:H + 1]                                             # (1, 1)
    logits = jnp.sum(tanhed * wv_row, axis=-1, keepdims=True) + bv   # (B, S, 1)

    # Softmax over SEQ, kept on sublanes (axis=1) — no relayout of att.
    m = jnp.max(logits, axis=1, keepdims=True)
    e = jnp.exp(logits - m)
    denom = jnp.sum(e, axis=1, keepdims=True)
    att = e * pl.reciprocal(denom, approx=True)                      # (B, S, 1)

    # context[b, :] = sum_s att[b, s] * keys[b, s, :]
    context = jnp.sum(att * keys, axis=1)                            # (B, H)

    ctx_ref[...] = context.astype(ctx_ref.dtype)
    att_ref[...] = att.astype(att_ref.dtype)


@jax.jit
def bahdanau_attention(lstm_outputs, final_hidden, params):
    """lstm_outputs: (B, S, H) f32, final_hidden: (B, H) f32.
    Params are in PyTorch nn.Linear layout: w* = (out, in), b* = (out,)."""
    B, S, H = lstm_outputs.shape

    # Host-side layout plumbing (pre-transpose, fuse, pack) — traced into the
    # surrounding XLA program, never inside the kernel.
    x_packed = jnp.concatenate(
        [lstm_outputs.reshape(B * S, H), final_hidden], axis=0)      # (B*S+B, H)
    w_packed = jnp.concatenate(
        [params["wk"].T, params["wq"].T], axis=1)                    # (H, 2H)
    row0 = jnp.concatenate([params["bk"], params["bq"]])             # (2H,)
    row1 = jnp.concatenate(
        [params["wv"][0], params["bv"], jnp.zeros((H - 1,), jnp.float32)])
    p_packed = jnp.stack([row0, row1], axis=0)                       # (2, 2H)

    vmem = pl.BlockSpec(memory_space=pltpu.MemorySpace.VMEM)
    ctx, att3 = pl.pallas_call(
        bahdanau_kernel,
        out_shape=(jax.ShapeDtypeStruct((B, H), jnp.float32),
                   jax.ShapeDtypeStruct((B, S, 1), jnp.float32)),
        in_specs=[vmem, vmem, vmem],
        out_specs=(vmem, vmem),
    )(x_packed, w_packed, p_packed)
    return ctx, att3[..., 0]


def init_params(key, hidden=HIDDEN_SIZE):
    # Deterministic init (uniform ~ 1/sqrt(fan_in), like nn.Linear default).
    ks = jax.random.split(key, 6)
    s = 1.0 / jnp.sqrt(hidden)
    return {
        "wq": jax.random.uniform(ks[0], (hidden, hidden), jnp.float32, -s, s),
        "bq": jax.random.uniform(ks[1], (hidden,), jnp.float32, -s, s),
        "wk": jax.random.uniform(ks[2], (hidden, hidden), jnp.float32, -s, s),
        "bk": jax.random.uniform(ks[3], (hidden,), jnp.float32, -s, s),
        "wv": jax.random.uniform(ks[4], (1, hidden), jnp.float32, -s, s),
        "bv": jax.random.uniform(ks[5], (1,), jnp.float32, -s, s),
    }


def reference(lstm_outputs, final_hidden, p):
    keys = lstm_outputs @ p["wk"].T + p["bk"]
    query = final_hidden @ p["wq"].T + p["bq"]
    tanhed = jnp.tanh(query[:, None, :] + keys)
    vector = (tanhed @ p["wv"].T)[..., 0] + p["bv"][0]
    att = jax.nn.softmax(vector, axis=-1)
    context = jnp.einsum("bs,bsh->bh", att, keys)
    return context, att


if __name__ == "__main__":
    key = jax.random.PRNGKey(0)
    k_lstm, k_fh, k_p = jax.random.split(key, 3)
    lstm_outputs = jax.random.normal(k_lstm, (BATCH, SEQ, HIDDEN_SIZE), jnp.float32)
    final_hidden = jax.random.normal(k_fh, (BATCH, HIDDEN_SIZE), jnp.float32)
    params = init_params(k_p)

    ctx, att = bahdanau_attention(lstm_outputs, final_hidden, params)
    jax.block_until_ready((ctx, att))

    ctx_ref, att_ref = reference(lstm_outputs, final_hidden, params)
    assert ctx.shape == (BATCH, HIDDEN_SIZE) and att.shape == (BATCH, SEQ)
    # Tolerance loosened to 1e-3 because the softmax denominator uses the
    # approximate EUP reciprocal (pl.reciprocal(approx=True)).
    assert jnp.allclose(ctx, ctx_ref, atol=1e-3, rtol=1e-3)
    assert jnp.allclose(att, att_ref, atol=1e-3, rtol=1e-3)
    print("KERNEL_OK")
</pallas_src>

<mosaic_0001>
module attributes {stable_mosaic.version = 11 : i64} {
  func.func @bahdanau_kernel(%arg0: memref<18x32xf32, #tpu.memory_space<vmem>>, %arg1: memref<32x64xf32, #tpu.memory_space<vmem>>, %arg2: memref<2x64xf32, #tpu.memory_space<vmem>>, %arg3: memref<2x32xf32, #tpu.memory_space<vmem>>, %arg4: memref<2x8x1xf32, #tpu.memory_space<vmem>>) attributes {dimension_semantics = [], scalar_prefetch = 0 : i64, scratch_operands = 0 : i64, tpu.core_type = #tpu.core_type<tc>} {
    %c0 = arith.constant 0 : index
    %c0_0 = arith.constant 0 : index
    %0 = vector.load %arg0[%c0, %c0_0] : memref<18x32xf32, #tpu.memory_space<vmem>>, vector<18x32xf32>
    %c0_1 = arith.constant 0 : index
    %c0_2 = arith.constant 0 : index
    %1 = vector.load %arg1[%c0_1, %c0_2] : memref<32x64xf32, #tpu.memory_space<vmem>>, vector<32x64xf32>
    %c0_3 = arith.constant 0 : index
    %c0_4 = arith.constant 0 : index
    %2 = vector.load %arg2[%c0_3, %c0_4] : memref<2x64xf32, #tpu.memory_space<vmem>>, vector<2x64xf32>
    %cst = arith.constant dense<0.000000e+00> : vector<18x64xf32>
    %3 = tpu.matmul %0, %1, %cst {dimension_numbers = #tpu.dot_dimension_numbers<[1], [0], [0], [1], [0, 0, 1, 1], [], []>} : vector<18x32xf32>, vector<32x64xf32>, vector<18x64xf32> -> vector<18x64xf32>
    %4 = vector.extract_strided_slice %2 {offsets = [0, 0], sizes = [1, 64], strides = [1, 1]} : vector<2x64xf32> to vector<1x64xf32>
    %5 = vector.broadcast %4 : vector<1x64xf32> to vector<18x64xf32>
    %6 = arith.addf %3, %5 : vector<18x64xf32>
    %7 = vector.extract_strided_slice %6 {offsets = [0, 0], sizes = [16, 32], strides = [1, 1]} : vector<18x64xf32> to vector<16x32xf32>
    %8 = vector.shape_cast %7 : vector<16x32xf32> to vector<2x8x32xf32>
    %9 = vector.extract_strided_slice %6 {offsets = [16, 32], sizes = [2, 32], strides = [1, 1]} : vector<18x64xf32> to vector<2x32xf32>
    %10 = vector.shape_cast %9 : vector<2x32xf32> to vector<2x1x32xf32>
    %11 = vector.broadcast %10 : vector<2x1x32xf32> to vector<2x8x32xf32>
    %12 = arith.addf %11, %8 : vector<2x8x32xf32>
    %13 = math.tanh %12 : vector<2x8x32xf32>
    %14 = vector.extract_strided_slice %2 {offsets = [1, 0], sizes = [1, 32], strides = [1, 1]} : vector<2x64xf32> to vector<1x32xf32>
    %15 = vector.extract_strided_slice %2 {offsets = [1, 32], sizes = [1, 1], strides = [1, 1]} : vector<2x64xf32> to vector<1x1xf32>
    %16 = vector.shape_cast %14 : vector<1x32xf32> to vector<1x1x32xf32>
    %17 = vector.broadcast %16 : vector<1x1x32xf32> to vector<2x8x32xf32>
    %18 = arith.mulf %13, %17 : vector<2x8x32xf32>
    %cst_5 = arith.constant dense<0.000000e+00> : vector<2x8xf32>
    %19 = vector.multi_reduction <add>, %18, %cst_5 [2] : vector<2x8x32xf32> to vector<2x8xf32>
    %20 = vector.shape_cast %19 : vector<2x8xf32> to vector<2x8x1xf32>
    %21 = vector.shape_cast %15 : vector<1x1xf32> to vector<1x1x1xf32>
    %22 = vector.broadcast %21 : vector<1x1x1xf32> to vector<2x8x1xf32>
    %23 = arith.addf %20, %22 : vector<2x8x1xf32>
    %cst_6 = arith.constant dense<0xFF800000> : vector<2x1xf32>
    %24 = vector.multi_reduction <maximumf>, %23, %cst_6 [1] : vector<2x8x1xf32> to vector<2x1xf32>
    %25 = vector.shape_cast %24 : vector<2x1xf32> to vector<2x1x1xf32>
    %26 = vector.broadcast %25 : vector<2x1x1xf32> to vector<2x8x1xf32>
    %27 = arith.subf %23, %26 : vector<2x8x1xf32>
    %28 = math.exp %27 : vector<2x8x1xf32>
    %cst_7 = arith.constant dense<0.000000e+00> : vector<2x1xf32>
    %29 = vector.multi_reduction <add>, %28, %cst_7 [1] : vector<2x8x1xf32> to vector<2x1xf32>
    %30 = vector.shape_cast %29 : vector<2x1xf32> to vector<2x1x1xf32>
    %31 = tpu.reciprocal %30 {approx = true} : vector<2x1x1xf32> -> vector<2x1x1xf32>
    %32 = vector.broadcast %31 : vector<2x1x1xf32> to vector<2x8x1xf32>
    %33 = arith.mulf %28, %32 : vector<2x8x1xf32>
    %34 = vector.broadcast %33 : vector<2x8x1xf32> to vector<2x8x32xf32>
    %35 = arith.mulf %34, %8 : vector<2x8x32xf32>
    %cst_8 = arith.constant dense<0.000000e+00> : vector<2x32xf32>
    %36 = vector.multi_reduction <add>, %35, %cst_8 [1] : vector<2x8x32xf32> to vector<2x32xf32>
    %c0_9 = arith.constant 0 : index
    %c0_10 = arith.constant 0 : index
    %37 = vector.load %arg3[%c0_9, %c0_10] : memref<2x32xf32, #tpu.memory_space<vmem>>, vector<2x32xf32>
    tpu.vector_store %arg3[%c0_9, %c0_10], %36 {strides = array<i32>} : memref<2x32xf32, #tpu.memory_space<vmem>>, vector<2x32xf32>,
    %c0_11 = arith.constant 0 : index
    %c0_12 = arith.constant 0 : index
    %c0_13 = arith.constant 0 : index
    %38 = vector.load %arg4[%c0_11, %c0_12, %c0_13] : memref<2x8x1xf32, #tpu.memory_space<vmem>>, vector<2x8x1xf32>
    tpu.vector_store %arg4[%c0_11, %c0_12, %c0_13], %33 {strides = array<i32>} : memref<2x8x1xf32, #tpu.memory_space<vmem>>, vector<2x8x1xf32>,
    return
  }
}

</mosaic_0001>

<bundles_post_ra>
// kernel: bahdanau_attention.1
= control target key start
LH: loop header
LB: loop body
LE: loop exit
PB: predicated region body
PF: predicated region fallthrough
CT: control target
= control target key end

     0   :  { %v372_v3 = vmov 0.0|0.0   ;;  %vm373_vm0 = vmmov 0   ;;  %v374_v6 = vmov 0.0   ;;  %s473_s0 = inlined_call_operand.vmem [shape: f32[18,32], index: 0, kind: input, shape index: {}]   ;;  %s474_s1 = inlined_call_operand.vmem [shape: f32[32,64], index: 1, kind: input, shape index: {}]   ;;  %s475_s2 = inlined_call_operand.vmem [shape: f32[2,64], index: 2, kind: input, shape index: {}]   ;;  %s476_s3 = inlined_call_operand.hbm [shape: f32[2,32], index: 3, kind: output, shape index: {0}]   ;;  %s477_s4 = inlined_call_operand.vmem [shape: f32[2,8,1], index: 4, kind: output, shape index: {1}]  }
   0x1   :  { %v20_v0 = vld [vmem:[%s474_s1] sm:$0xff]  ;;  %v21_v1 = vld [vmem:[%s474_s1 + $0x8] sm:$0xff]  ;;  %v22_v2 = vld [vmem:[%s474_s1 + $0x10] sm:$0xff]  ;;  %316 = vmatprep.subr.bf16.mxu0 %v372_v3  ;;  %322 = vmatprep.subr.bf16.mxu1 %v372_v3 }
   0x2   :  { %v317_v4 = vpack.c.bf16 %v21_v1, %v20_v0  ;;  %v23_v5 = vld [vmem:[%s474_s1 + $0x18] sm:$0xff]  ;;  %307 = vmatprep.mubr.msk.f32.mxu0 %vm373_vm0, %v374_v6  ;;  %310 = vmatprep.mubr.msk.f32.mxu1 %vm373_vm0, %v374_v6 }
   0x3   :  { %v320_v7 = vpack.c.bf16 %v23_v5, %v22_v2 }
   0x4   :  { %318 = vmatpush3.bf16.msra.mxu0 %v317_v4  ;;  %324 = vmatpush3.bf16.msra.mxu1 %v317_v4 }
   0x5   :  { %10 = vsyncpa [#allocation3], 0  ;;  %319 = vmatprep.subr.bf16.mxu0 %v372_v3  ;;  %323 = vmatprep.subr.bf16.mxu1 %v372_v3  ;;  %v17_v8 = vld [vmem:[%s473_s0] sm:$0xff]  ;;  %vm29_vm1 = vcmask 261120   ;;  %v18_v9 = vld [vmem:[%s473_s0 + $0x8] sm:$0xff]  ;;  %v25_v11 = vlaneseq  ;;  %s375_s30 = smov 32  }
   0x6   :  { %v19_v10 = vld [vmem:[%s473_s0 + $0x10] sm:$0x3]  ;;  %v24_v14 = vld [vmem:[%s475_s2] sm:$0x3]  ;;  %v376_v27 = vmov 1966171168  }
   0x7   :  { %v26_v12 = vshrl.u32 %v25_v11, 7  ;;  %v121_v28 = vunpack.c.l.s4 %v376_v27  ;;  %s377_s0 = smov 96   ;;  %v378_v50 = vmov 32   ;;  %vm190_vm2 = vcmask 269568   ;;  %s379_s8 = smov [#allocation2]  }
   0x8   :  { %321 = vmatpush3.bf16.msra.mxu0 %v320_v7  ;;  %325 = vmatpush3.bf16.msra.mxu1 %v320_v7  ;;  %vm268_vm3 = vcmask 7168   ;;  %s277_s9 = sshll.u32 %s379_s8, 4  ;;  %vm257_vm4 = vcmask 1041409   ;;  %vm260_vm5 = vcmask 254976   ;;  %s278_s9 = int_to_ptr.vmem [resolvable:$true] %s277_s9 }
   0x9   :  { %v166_v13 = vsub.s32 1, %v26_v12  ;;  %v27_v16 = vsub.s32 0, %v26_v12  ;;  %v122_v29 = vunpack.c.0.s8 %v121_v28  ;;  %334 = vset.pattern.permute.xlu0 %v378_v50  ;;  %335 = vset.pattern.permute.xlu1 %v378_v50  ;;  %s348_s10 = scalar_lea.vmem %s278_s9, 32  ;;  %p353_p1 = scmp.lt.s32.totalorder %s278_s9, %s278_s9 }
   0xa   :  { %p349_p0 = scmp.ne.s32.totalorder %s278_s9, %s348_s10  ;;  %p354_p2 = scmp.lt.s32.totalorder %s348_s10, %s348_s10 }
   0xb   :  { %308 = vmatmul.mubr.msk.f32.vlgmr.msra.gmra.mrb[0].mxu0 %vm29_vm1, %v17_v8  ;;  %311 = vmatmul.mubr.msk.f32.vlgmr.msra.gmra.mrb[0].mxu1 %vm29_vm1, %v18_v9  ;;  %v167_v15 = vrot.slane %v24_v14, %v166_v13  ;;  %v28_v17 = vrot.slane %v24_v14, %v27_v16  ;;  %v125_v30 = vsub.s32 %v122_v29, %v26_v12 }
   0xc   :  { %313 = vmatprep.mubr.msk.f32.mxu1 %vm373_vm0, %v374_v6  ;;  %p355_p3 = por %p354_p2, %p353_p1 }
   0xd   :  { %169 = vrot.lane.b32.xlu1 %v167_v15, %s375_s30 }
   0xe   :  { %p356_p4 = pnand %p355_p3, %p349_p0 }
   0xf   :  { %314 = vmatmul.mubr.msk.f32.gmra.mrb[2].mxu1 %vm29_vm1, %v19_v10 }
  0x7f   :  { %v170_v41 = vpop.permute.xlu1 %169 }
  0xde   :  { %v105_v18 = vpop.f32.mrb[0].mxu0  ;;  %v110_v19 = vpop.f32.mrb[0].mxu1 }
  0xdf   :  { %v435_v20 = vadd.f32 %v105_v18, %v28_v17  ;;  %v309_v21 = vpop.f32.mrb[1].mxu0  ;;  %v312_v22 = vpop.f32.mrb[1].mxu1  ;;  %v437_v23 = vadd.f32 %v110_v19, %v28_v17 }
  0xe1   :  { %154 = vrot.lane.b32.xlu0 %v435_v20, %s375_s30 }
  0xe2   :  { %v115_v24 = vpop.f32.mrb[2].mxu1 }
  0xe3   :  { %v116_v25 = vadd.f32 %v115_v24, %v28_v17  ;;  %v315_v26 = vpop.f32.mrb[3].mxu1 }
  0xe5   :  { %156 = vrot.lane.b32.xlu0 %v437_v23, %s375_s30  ;;  %v126_v31 = vrot.slane %v116_v25, %v125_v30 }
  0xe7   :  { %v127_v32 = vcombine.high %v126_v31, %v126_v31  ;;  %v134_v33 = vrot.slane %v126_v31, %v125_v30 }
  0xe9   :  { %v145_v34 = vrot.slane %v134_v33, %v27_v16  ;;  %v141_v35 = vrot.slane %v127_v32, %v125_v30 }
  0xeb   :  { %v149_v38 = vrot.slane %v141_v35, %v27_v16 }
 0x153   :  { %v155_v36 = vpop.permute.xlu0 %154 }
 0x154   :  { %v160_v37 = vadd.f32 %v155_v36, %v145_v34 }
 0x156   :  { %336 = vtanh.f32 %v160_v37 }
 0x157   :  { %v157_v39 = vpop.permute.xlu0 %156 }
 0x158   :  { %v161_v40 = vadd.f32 %v157_v39, %v149_v38 }
 0x15a   :  { %338 = vtanh.f32 %v161_v40 }
 0x160   :  { %v337_v42 = vpop.eup %336 }
 0x161   :  { %v172_v43 = vmul.f32 %v337_v42, %v170_v41 }
 0x163   :  { %176 = vrot.lane.b32.xlu1 %v172_v43, %s377_s0 }
 0x164   :  { %v339_v44 = vpop.eup %338 }
 0x165   :  { %v173_v45 = vmul.f32 %v339_v44, %v170_v41 }
 0x167   :  { %178 = vrot.lane.b32.xlu0 %v173_v45, %s377_s0 }
 0x1d5   :  { %v177_v46 = vpop.permute.xlu1 %176 }
 0x1d6   :  { %v182_v47 = vsel %vm29_vm1, %v177_v46, 0.0 }
 0x1d7   :  { %183 = vadd.xlane.f32.xlu1 %v182_v47 }
 0x1d9   :  { %v179_v48 = vpop.permute.xlu0 %178 }
 0x1da   :  { %v185_v49 = vsel %vm29_vm1, %v179_v48, 0.0 }
 0x1db   :  { %186 = vadd.xlane.f32.xlu0 %v185_v49 }
 0x264   :  { %v184_v51 = vpop.xlane.xlu1 %183 }
 0x265   :  { %v188_v52 = vadd.f32 %v184_v51, %v167_v15 }
 0x267   :  { %v191_v53 = vsel %vm190_vm2, %v188_v52, -inf }
 0x268   :  { %v192_v54 = vrot.slane %v191_v53, 4  ;;  %v187_v55 = vpop.xlane.xlu0 %186 }
 0x269   :  { %v189_v56 = vadd.f32 %v187_v55, %v167_v15 }
 0x26a   :  { %v193_v57 = vmax.f32 %v191_v53, %v192_v54 }
 0x26b   :  { %v198_v58 = vsel %vm190_vm2, %v189_v56, -inf }
 0x26c   :  { %v194_v59 = vrot.slane %v193_v57, 2  ;;  %v199_v60 = vrot.slane %v198_v58, 4 }
 0x26e   :  { %v195_v61 = vmax.f32 %v193_v57, %v194_v59  ;;  %v200_v62 = vmax.f32 %v198_v58, %v199_v60 }
 0x270   :  { %v196_v63 = vrot.slane %v195_v61, 1  ;;  %v201_v0 = vrot.slane %v200_v62, 2 }
 0x272   :  { %v197_v1 = vmax.f32 %v195_v61, %v196_v63  ;;  %v202_v2 = vmax.f32 %v200_v62, %v201_v0 }
 0x274   :  { %v205_v3 = vsub.f32 %v188_v52, %v197_v1  ;;  %v203_v4 = vrot.slane %v202_v2, 1 }
 0x276   :  { %v207_v5 = vmul.f32 1.442695, %v205_v3  ;;  %v204_v6 = vmax.f32 %v202_v2, %v203_v4 }
 0x278   :  { %340 = vpow2.f32 %v207_v5  ;;  %v206_v7 = vsub.f32 %v189_v56, %v204_v6 }
 0x27a   :  { %v209_v8 = vmul.f32 1.442695, %v206_v7 }
 0x27c   :  { %342 = vpow2.f32 %v209_v8 }
 0x282   :  { %v341_v9 = vpop.eup %340 }
 0x283   :  { %v211_v10 = vsel %vm190_vm2, %v341_v9, 0.0 }
 0x284   :  { %v212_v11 = vrot.slane %v211_v10, 4 }
 0x286   :  { %v343_v12 = vpop.eup %342  ;;  %v213_v13 = vadd.f32 %v212_v11, %v211_v10 }
 0x287   :  { %v218_v14 = vsel %vm190_vm2, %v343_v12, 0.0 }
 0x288   :  { %v214_v15 = vrot.slane %v213_v13, 2  ;;  %v219_v16 = vrot.slane %v218_v14, 4 }
 0x28a   :  { %v215_v17 = vadd.f32 %v214_v15, %v213_v13  ;;  %v220_v18 = vadd.f32 %v219_v16, %v218_v14 }
 0x28c   :  { %v216_v19 = vrot.slane %v215_v17, 1  ;;  %v221_v21 = vrot.slane %v220_v18, 2 }
 0x28e   :  { %v217_v22 = vadd.f32 %v216_v19, %v215_v17  ;;  %v222_v24 = vadd.f32 %v221_v21, %v220_v18 }
 0x290   :  { %344 = vrcp.f32 %v217_v22  ;;  %v223_v25 = vrot.slane %v222_v24, 1 }
 0x292   :  { %v224_v26 = vadd.f32 %v223_v25, %v222_v24 }
 0x294   :  { %346 = vrcp.f32 %v224_v26 }
 0x29a   :  { %v345_v27 = vpop.eup %344 }
 0x29b   :  { %v227_v28 = vmul.f32 %v345_v27, %v341_v9 }
 0x29d   :  { %231 = vperm.xlu0 %334, %v227_v28  }
 0x29e   :  { %v347_v29 = vpop.eup %346 }
 0x29f   :  { %v228_v30 = vmul.f32 %v347_v29, %v343_v12 }
 0x2a1   :  { %236 = vperm.xlu1 %335, %v228_v30  }
 0x2a5   :  { %262 = vrot.lane.b32.xlu1 %v227_v28, %s377_s0 }
 0x2a9   :  { %264 = vrot.lane.b32.xlu1 %v228_v30, %s377_s0 }
 0x31c   :  { %v232_v31 = vpop.permute.xlu0 %231 }
 0x31d   :  { %v239_v32 = vmul.f32 %v232_v31, %v435_v20 }
 0x31f   :  { %v241_v33 = vsel %vm29_vm1, %v239_v32, 0.0 }
 0x320   :  { %v242_v34 = vrot.slane %v241_v33, 4  ;;  %v237_v35 = vpop.permute.xlu1 %236 }
 0x321   :  { %v240_v36 = vmul.f32 %v237_v35, %v437_v23 }
 0x322   :  { %v243_v37 = vadd.f32 %v242_v34, %v241_v33 }
 0x323   :  { %v248_v38 = vsel %vm29_vm1, %v240_v36, 0.0 }
 0x324   :  { %v244_v39 = vrot.slane %v243_v37, 2  ;;  %v249_v40 = vrot.slane %v248_v38, 4  ;;  %v263_v41 = vpop.permute.xlu1 %262 }
 0x325   :  { %269 = vst.msk [vmem:[%s477_s4] sm:$0xff] %vm268_vm3, %v263_v41 }
 0x326   :  { %v245_v42 = vadd.f32 %v244_v39, %v243_v37  ;;  %v250_v43 = vadd.f32 %v249_v40, %v248_v38 }
 0x328   :  { %v251_v20 = vrot.slane %v250_v43, 2  ;;  %v265_v44 = vpop.permute.xlu1 %264  ;;  %v246_v23 = vrot.slane %v245_v42, 1 }
 0x329   :  { %270 = vst.msk [vmem:[%s477_s4 + $0x8] sm:$0xff] %vm268_vm3, %v265_v44 }
 0x32a   :  { %v252_v45 = vadd.f32 %v251_v20, %v250_v43  ;;  %v247_v47 = vadd.f32 %v246_v23, %v245_v42 }
 0x32c   :  { %v253_v46 = vrot.slane %v252_v45, 1 }
 0x32e   :  { %v254_v48 = vadd.f32 %v253_v46, %v252_v45 }
 0x330   :  { %v258_v49 = vsel %vm257_vm4, %v254_v48, %v247_v47 }
 0x331   :  { %261 = vst.msk [vmem:[#allocation2] sm:$0x3] %vm260_vm5, %v258_v49 }
 0x332   :  { %359 = shalt.err (!%p356_p4)
}
 0x333   :  { %s360_s12 = scalar_lea.hbm %s476_s3, 32 }
 0x334   :  { %p361_p5 = scmp.ne.s32.totalorder %s476_s3, %s360_s12  ;;  %p364_p6 = scmp.lt.u32.totalorder %s360_s12, %s476_s3 }
 0x336   :  { %p366_p7 = pnand %p364_p6, %p361_p5 }
 0x338   :  { %369 = shalt.err (!%p366_p7)
}
 0x339   :  { %280 = dma.vmem_to_hbm [thread:$0]  %s278_s9, 32, %s476_s3, [#allocation3]  }
 0x33a   :  { %370 = dma.done.wait [#allocation3], 32  }
 0x33b   :  { %371 = vsyncadd [#allocation3], 4294967264 }
 0x33c   :  { %288 = vsyncpa [#allocation3], 1 }

</bundles_post_ra>
